<compile_context>
chip_gen: v5e
topology: v5e:2x2
jax: 0.10.0
libtpu: 0.0.40
codegen_flags: <defaults>
</compile_context>

<pallas_src>
import functools

import jax
import jax.numpy as jnp
from jax.experimental import pallas as pl
from jax.experimental.pallas import tpu as pltpu

# ---- model hyper-params (small, consistent with the module) ----------------
DIM = 128                  # dim_model
HEADS = 4                  # number of heads
DIM_HEAD = DIM // HEADS    # 32; also the scale's dim_head
BATCH = 2
SEQ = 8


def mha_kernel(x_ref, wqkv_ref, wout_ref, o_ref, *, heads, dim_head):
    """Fused causal MHA for a block of `bb` batch elements.

    x_ref:    (bb, N, D)   bf16 input block
    wqkv_ref: (D, 3D)      bf16 qkv weight, transposed at init, scale folded into Q rows
    wout_ref: (D, D)       bf16 output weight, transposed at init (rows = input features)
    o_ref:    (bb, N, D)   f32 output block
    """
    bb, n, d = x_ref.shape
    x = x_ref[...].reshape(bb * n, d)                       # (bb*N, D) bf16

    # Fused QKV projection on the MXU (softmax scale already folded into Q rows).
    qkv = jnp.dot(x, wqkv_ref[...], preferred_element_type=jnp.float32)  # (bb*N, 3D) f32
    q = qkv[:, :d]
    k = qkv[:, d:2 * d]
    v = qkv[:, 2 * d:]

    # Strictly-upper-triangular causal mask (j > i), built once.
    row = jax.lax.broadcasted_iota(jnp.int32, (n, n), 0)
    col = jax.lax.broadcasted_iota(jnp.int32, (n, n), 1)
    causal = col > row
    neg_max = -jnp.finfo(jnp.float32).max

    for b in range(bb):                      # static unroll over batches in this block
        rows = slice(b * n, (b + 1) * n)
        out_b = jnp.zeros((n, d), jnp.float32)
        for h in range(heads):               # static unroll over heads
            lo = h * dim_head
            hi = lo + dim_head
            qh = q[rows, lo:hi]              # (N, dh) f32
            kh = k[rows, lo:hi]
            vh = v[rows, lo:hi]

            # (N, N) logits; contract last dims directly (no explicit kh.T).
            sim = jax.lax.dot_general(
                qh, kh, (((1,), (1,)), ((), ())),
                preferred_element_type=jnp.float32)
            sim = jnp.where(causal, neg_max, sim)

            # Numerically stable softmax; divide goes to the EUP.
            m = jnp.max(sim, axis=-1, keepdims=True)
            e = jnp.exp(sim - m)
            p = e * pl.reciprocal(jnp.sum(e, axis=-1, keepdims=True), approx=True)

            oh = jnp.dot(p, vh, preferred_element_type=jnp.float32)      # (N, dh)

            # Fold the 'b h n d -> b n (h d)' concat into the output projection:
            # accumulate oh @ W_out_t[lo:hi, :]  (sublane-aligned weight slice).
            out_b = out_b + jnp.dot(oh.astype(jnp.bfloat16),
                                    wout_ref[lo:hi, :],
                                    preferred_element_type=jnp.float32)  # (N, D)
        o_ref[b] = out_b.astype(o_ref.dtype)


def prepare_weights(w_qkv, w_out, *, dim, dim_head):
    """One-time weight prep at model init (NOT in the hot forward path).

    w_qkv: (3D, D) torch nn.Linear layout; w_out: (D, D) torch layout.
    Folds the softmax scale into the Q output rows, transposes so the kernel
    computes plain x @ W, and casts to bf16 to halve the weight DMA bytes.
    """
    scale = dim_head ** (-0.5)
    w_qkv_scaled = w_qkv.at[:dim, :].multiply(scale)        # Q rows only
    wqkv_t = w_qkv_scaled.T.astype(jnp.bfloat16)            # (D, 3D)
    wout_t = w_out.T.astype(jnp.bfloat16)                   # (D_in, D_out)
    return wqkv_t, wout_t


def _single_tensorcore():
    """True on 1-TensorCore-per-device generations (v5e / v6e): there we fold
    the whole batch into one grid step.  On v7x (2 TCs/chip) we keep grid=(B,)
    'parallel' so each batch element lands on its own TensorCore."""
    try:
        kind = jax.devices()[0].device_kind.lower()
    except Exception:
        return False
    return any(t in kind for t in ("v5e", "v5 lite", "v5lite",
                                   "v6e", "v6 lite", "v6lite"))


@functools.partial(jax.jit, static_argnames=("heads", "dim_head", "block_batch"))
def base_mha(x, wqkv_t, wout_t, *, heads, dim_head, block_batch):
    """x: (B, N, D) f32; wqkv_t: (D, 3D) bf16; wout_t: (D, D) bf16 (prepared)."""
    b, n, d = x.shape
    assert heads * dim_head == d
    assert b % block_batch == 0
    nb = b // block_batch

    x_bf16 = x.astype(jnp.bfloat16)          # only activation bytes cast per call

    kernel = functools.partial(mha_kernel, heads=heads, dim_head=dim_head)
    return pl.pallas_call(
        kernel,
        out_shape=jax.ShapeDtypeStruct((b, n, d), jnp.float32),
        grid_spec=pl.GridSpec(
            grid=(nb,),
            in_specs=[
                pl.BlockSpec((block_batch, n, d), lambda i: (i, 0, 0)),
                pl.BlockSpec((d, 3 * d), lambda i: (0, 0)),
                pl.BlockSpec((d, d), lambda i: (0, 0)),
            ],
            out_specs=pl.BlockSpec((block_batch, n, d), lambda i: (i, 0, 0)),
        ),
        compiler_params=pltpu.CompilerParams(
            dimension_semantics=("parallel",)),
    )(x_bf16, wqkv_t, wout_t)


def base_mha_ref(x, w_qkv, w_out, *, heads=HEADS, dim_head=DIM_HEAD):
    """Pure-JAX f32 reference mirroring the PyTorch forward."""
    b, n, d = x.shape
    scale = dim_head ** (-0.5)
    qkv = x @ w_qkv.T                                   # (B, N, 3D)
    q, k, v = jnp.split(qkv, 3, axis=-1)

    def to_heads(t):
        return t.reshape(b, n, heads, d // heads).transpose(0, 2, 1, 3)

    q, k, v = to_heads(q), to_heads(k), to_heads(v)
    sim = jnp.einsum('bhnj,bhmj->bhnm', q, k) * scale
    mask = jnp.triu(jnp.ones((n, n), dtype=bool), k=1)
    sim = jnp.where(mask[None, None], -jnp.finfo(sim.dtype).max, sim)
    p = jax.nn.softmax(sim, axis=-1)
    attn = jnp.einsum('bhnm,bhmd->bhnd', p, v)
    out = attn.transpose(0, 2, 1, 3).reshape(b, n, d)
    return out @ w_out.T


if __name__ == "__main__":
    key = jax.random.PRNGKey(0)
    kx, kw1, kw2 = jax.random.split(key, 3)

    x = jax.random.normal(kx, (BATCH, SEQ, DIM), dtype=jnp.float32)
    # torch nn.Linear(dim, dim*3, bias=False).weight has shape (3*dim, dim)
    w_qkv = jax.random.normal(kw1, (3 * DIM, DIM), dtype=jnp.float32) * (DIM ** -0.5)
    # torch nn.Linear(dim, dim, bias=False).weight has shape (dim, dim)
    w_out = jax.random.normal(kw2, (DIM, DIM), dtype=jnp.float32) * (DIM ** -0.5)

    # One-time weight preparation at "model init" (outside the hot path).
    wqkv_t, wout_t = prepare_weights(w_qkv, w_out, dim=DIM, dim_head=DIM_HEAD)

    # Generation-aware grid: fold batch on 1-TC chips, split across TCs on v7x.
    block_batch = BATCH if _single_tensorcore() else 1

    out = base_mha(x, wqkv_t, wout_t,
                   heads=HEADS, dim_head=DIM_HEAD, block_batch=block_batch)
    out = jax.block_until_ready(out)

    ref = base_mha_ref(x, w_qkv, w_out)
    assert out.shape == (BATCH, SEQ, DIM)
    # bf16 matmul operands + approx reciprocal vs. full-f32 reference -> loose tol.
    assert jnp.allclose(out, ref, atol=5e-2, rtol=5e-2), "mismatch vs reference"

    print("KERNEL_OK")
</pallas_src>

<mosaic_0001>
module attributes {stable_mosaic.version = 11 : i64} {
  func.func @mha_kernel(%arg0: i32, %arg1: memref<1x8x128xbf16, #tpu.memory_space<vmem>>, %arg2: memref<128x384xbf16, #tpu.memory_space<vmem>>, %arg3: memref<128x128xbf16, #tpu.memory_space<vmem>>, %arg4: memref<1x8x128xf32, #tpu.memory_space<vmem>>) attributes {dimension_semantics = [#tpu.dimension_semantics<parallel>], iteration_bounds = array<i64: 2>, scalar_prefetch = 0 : i64, scratch_operands = 0 : i64, tpu.core_type = #tpu.core_type<tc>, window_params = [{transform_indices = @transform_0, window_bounds = array<i64: 1, 8, 128>}, {pipeline_mode = #tpu.pipeline_mode<synchronous>, transform_indices = @transform_1, window_bounds = array<i64: 128, 384>}, {pipeline_mode = #tpu.pipeline_mode<synchronous>, transform_indices = @transform_2, window_bounds = array<i64: 128, 128>}, {transform_indices = @transform_3, window_bounds = array<i64: 1, 8, 128>}]} {
    %c0 = arith.constant 0 : index
    %c0_0 = arith.constant 0 : index
    %c0_1 = arith.constant 0 : index
    %0 = vector.load %arg1[%c0, %c0_0, %c0_1] : memref<1x8x128xbf16, #tpu.memory_space<vmem>>, vector<1x8x128xbf16>
    %1 = vector.shape_cast %0 : vector<1x8x128xbf16> to vector<8x128xbf16>
    %c0_2 = arith.constant 0 : index
    %c0_3 = arith.constant 0 : index
    %2 = vector.load %arg2[%c0_2, %c0_3] : memref<128x384xbf16, #tpu.memory_space<vmem>>, vector<128x384xbf16>
    %cst = arith.constant dense<0.000000e+00> : vector<8x384xf32>
    %3 = tpu.matmul %1, %2, %cst {dimension_numbers = #tpu.dot_dimension_numbers<[1], [0], [0], [1], [0, 0, 1, 1], [], []>} : vector<8x128xbf16>, vector<128x384xbf16>, vector<8x384xf32> -> vector<8x384xf32>
    %4 = vector.extract_strided_slice %3 {offsets = [0, 0], sizes = [8, 128], strides = [1, 1]} : vector<8x384xf32> to vector<8x128xf32>
    %5 = vector.extract_strided_slice %3 {offsets = [0, 128], sizes = [8, 128], strides = [1, 1]} : vector<8x384xf32> to vector<8x128xf32>
    %6 = vector.extract_strided_slice %3 {offsets = [0, 256], sizes = [8, 128], strides = [1, 1]} : vector<8x384xf32> to vector<8x128xf32>
    %7 = tpu.iota {dimensions = array<i32: 0>} : vector<8x8xi32>
    %8 = tpu.iota {dimensions = array<i32: 1>} : vector<8x8xi32>
    %9 = arith.cmpi sgt, %8, %7 : vector<8x8xi32>
    %cst_4 = arith.constant 0.000000e+00 : f32
    %10 = vector.broadcast %cst_4 : f32 to vector<8x128xf32>
    %11 = vector.extract_strided_slice %4 {offsets = [0, 0], sizes = [8, 32], strides = [1, 1]} : vector<8x128xf32> to vector<8x32xf32>
    %12 = vector.extract_strided_slice %5 {offsets = [0, 0], sizes = [8, 32], strides = [1, 1]} : vector<8x128xf32> to vector<8x32xf32>
    %13 = vector.extract_strided_slice %6 {offsets = [0, 0], sizes = [8, 32], strides = [1, 1]} : vector<8x128xf32> to vector<8x32xf32>
    %cst_5 = arith.constant dense<0.000000e+00> : vector<8x8xf32>
    %14 = tpu.matmul %11, %12, %cst_5 {dimension_numbers = #tpu.dot_dimension_numbers<[1], [1], [0], [0], [0, 0, 1, 0], [], []>} : vector<8x32xf32>, vector<8x32xf32>, vector<8x8xf32> -> vector<8x8xf32>
    %cst_6 = arith.constant -3.40282347E+38 : f32
    %15 = vector.broadcast %cst_6 : f32 to vector<8x8xf32>
    %16 = arith.select %9, %15, %14 : vector<8x8xi1>, vector<8x8xf32>
    %cst_7 = arith.constant dense<0xFF800000> : vector<8xf32>
    %17 = vector.multi_reduction <maximumf>, %16, %cst_7 [1] : vector<8x8xf32> to vector<8xf32>
    %18 = vector.shape_cast %17 : vector<8xf32> to vector<8x1xf32>
    %19 = vector.broadcast %18 : vector<8x1xf32> to vector<8x8xf32>
    %20 = arith.subf %16, %19 : vector<8x8xf32>
    %21 = math.exp %20 : vector<8x8xf32>
    %cst_8 = arith.constant dense<0.000000e+00> : vector<8xf32>
    %22 = vector.multi_reduction <add>, %21, %cst_8 [1] : vector<8x8xf32> to vector<8xf32>
    %23 = vector.shape_cast %22 : vector<8xf32> to vector<8x1xf32>
    %24 = tpu.reciprocal %23 {approx = true} : vector<8x1xf32> -> vector<8x1xf32>
    %25 = vector.broadcast %24 : vector<8x1xf32> to vector<8x8xf32>
    %26 = arith.mulf %21, %25 : vector<8x8xf32>
    %cst_9 = arith.constant dense<0.000000e+00> : vector<8x32xf32>
    %27 = tpu.matmul %26, %13, %cst_9 {dimension_numbers = #tpu.dot_dimension_numbers<[1], [0], [0], [1], [0, 0, 1, 1], [], []>} : vector<8x8xf32>, vector<8x32xf32>, vector<8x32xf32> -> vector<8x32xf32>
    %28 = arith.truncf %27 : vector<8x32xf32> to vector<8x32xbf16>
    %c0_10 = arith.constant 0 : index
    %c0_11 = arith.constant 0 : index
    %29 = vector.load %arg3[%c0_10, %c0_11] : memref<128x128xbf16, #tpu.memory_space<vmem>>, vector<32x128xbf16>
    %cst_12 = arith.constant dense<0.000000e+00> : vector<8x128xf32>
    %30 = tpu.matmul %28, %29, %cst_12 {dimension_numbers = #tpu.dot_dimension_numbers<[1], [0], [0], [1], [0, 0, 1, 1], [], []>} : vector<8x32xbf16>, vector<32x128xbf16>, vector<8x128xf32> -> vector<8x128xf32>
    %31 = arith.addf %10, %30 : vector<8x128xf32>
    %32 = vector.extract_strided_slice %4 {offsets = [0, 32], sizes = [8, 32], strides = [1, 1]} : vector<8x128xf32> to vector<8x32xf32>
    %33 = vector.extract_strided_slice %5 {offsets = [0, 32], sizes = [8, 32], strides = [1, 1]} : vector<8x128xf32> to vector<8x32xf32>
    %34 = vector.extract_strided_slice %6 {offsets = [0, 32], sizes = [8, 32], strides = [1, 1]} : vector<8x128xf32> to vector<8x32xf32>
    %cst_13 = arith.constant dense<0.000000e+00> : vector<8x8xf32>
    %35 = tpu.matmul %32, %33, %cst_13 {dimension_numbers = #tpu.dot_dimension_numbers<[1], [1], [0], [0], [0, 0, 1, 0], [], []>} : vector<8x32xf32>, vector<8x32xf32>, vector<8x8xf32> -> vector<8x8xf32>
    %cst_14 = arith.constant -3.40282347E+38 : f32
    %36 = vector.broadcast %cst_14 : f32 to vector<8x8xf32>
    %37 = arith.select %9, %36, %35 : vector<8x8xi1>, vector<8x8xf32>
    %cst_15 = arith.constant dense<0xFF800000> : vector<8xf32>
    %38 = vector.multi_reduction <maximumf>, %37, %cst_15 [1] : vector<8x8xf32> to vector<8xf32>
    %39 = vector.shape_cast %38 : vector<8xf32> to vector<8x1xf32>
    %40 = vector.broadcast %39 : vector<8x1xf32> to vector<8x8xf32>
    %41 = arith.subf %37, %40 : vector<8x8xf32>
    %42 = math.exp %41 : vector<8x8xf32>
    %cst_16 = arith.constant dense<0.000000e+00> : vector<8xf32>
    %43 = vector.multi_reduction <add>, %42, %cst_16 [1] : vector<8x8xf32> to vector<8xf32>
    %44 = vector.shape_cast %43 : vector<8xf32> to vector<8x1xf32>
    %45 = tpu.reciprocal %44 {approx = true} : vector<8x1xf32> -> vector<8x1xf32>
    %46 = vector.broadcast %45 : vector<8x1xf32> to vector<8x8xf32>
    %47 = arith.mulf %42, %46 : vector<8x8xf32>
    %cst_17 = arith.constant dense<0.000000e+00> : vector<8x32xf32>
    %48 = tpu.matmul %47, %34, %cst_17 {dimension_numbers = #tpu.dot_dimension_numbers<[1], [0], [0], [1], [0, 0, 1, 1], [], []>} : vector<8x8xf32>, vector<8x32xf32>, vector<8x32xf32> -> vector<8x32xf32>
    %49 = arith.truncf %48 : vector<8x32xf32> to vector<8x32xbf16>
    %c32 = arith.constant 32 : index
    %c0_18 = arith.constant 0 : index
    %50 = vector.load %arg3[%c32, %c0_18] : memref<128x128xbf16, #tpu.memory_space<vmem>>, vector<32x128xbf16>
    %cst_19 = arith.constant dense<0.000000e+00> : vector<8x128xf32>
    %51 = tpu.matmul %49, %50, %cst_19 {dimension_numbers = #tpu.dot_dimension_numbers<[1], [0], [0], [1], [0, 0, 1, 1], [], []>} : vector<8x32xbf16>, vector<32x128xbf16>, vector<8x128xf32> -> vector<8x128xf32>
    %52 = arith.addf %31, %51 : vector<8x128xf32>
    %53 = vector.extract_strided_slice %4 {offsets = [0, 64], sizes = [8, 32], strides = [1, 1]} : vector<8x128xf32> to vector<8x32xf32>
    %54 = vector.extract_strided_slice %5 {offsets = [0, 64], sizes = [8, 32], strides = [1, 1]} : vector<8x128xf32> to vector<8x32xf32>
    %55 = vector.extract_strided_slice %6 {offsets = [0, 64], sizes = [8, 32], strides = [1, 1]} : vector<8x128xf32> to vector<8x32xf32>
    %cst_20 = arith.constant dense<0.000000e+00> : vector<8x8xf32>
    %56 = tpu.matmul %53, %54, %cst_20 {dimension_numbers = #tpu.dot_dimension_numbers<[1], [1], [0], [0], [0, 0, 1, 0], [], []>} : vector<8x32xf32>, vector<8x32xf32>, vector<8x8xf32> -> vector<8x8xf32>
    %cst_21 = arith.constant -3.40282347E+38 : f32
    %57 = vector.broadcast %cst_21 : f32 to vector<8x8xf32>
    %58 = arith.select %9, %57, %56 : vector<8x8xi1>, vector<8x8xf32>
    %cst_22 = arith.constant dense<0xFF800000> : vector<8xf32>
    %59 = vector.multi_reduction <maximumf>, %58, %cst_22 [1] : vector<8x8xf32> to vector<8xf32>
    %60 = vector.shape_cast %59 : vector<8xf32> to vector<8x1xf32>
    %61 = vector.broadcast %60 : vector<8x1xf32> to vector<8x8xf32>
    %62 = arith.subf %58, %61 : vector<8x8xf32>
    %63 = math.exp %62 : vector<8x8xf32>
    %cst_23 = arith.constant dense<0.000000e+00> : vector<8xf32>
    %64 = vector.multi_reduction <add>, %63, %cst_23 [1] : vector<8x8xf32> to vector<8xf32>
    %65 = vector.shape_cast %64 : vector<8xf32> to vector<8x1xf32>
    %66 = tpu.reciprocal %65 {approx = true} : vector<8x1xf32> -> vector<8x1xf32>
    %67 = vector.broadcast %66 : vector<8x1xf32> to vector<8x8xf32>
    %68 = arith.mulf %63, %67 : vector<8x8xf32>
    %cst_24 = arith.constant dense<0.000000e+00> : vector<8x32xf32>
    %69 = tpu.matmul %68, %55, %cst_24 {dimension_numbers = #tpu.dot_dimension_numbers<[1], [0], [0], [1], [0, 0, 1, 1], [], []>} : vector<8x8xf32>, vector<8x32xf32>, vector<8x32xf32> -> vector<8x32xf32>
    %70 = arith.truncf %69 : vector<8x32xf32> to vector<8x32xbf16>
    %c64 = arith.constant 64 : index
    %c0_25 = arith.constant 0 : index
    %71 = vector.load %arg3[%c64, %c0_25] : memref<128x128xbf16, #tpu.memory_space<vmem>>, vector<32x128xbf16>
    %cst_26 = arith.constant dense<0.000000e+00> : vector<8x128xf32>
    %72 = tpu.matmul %70, %71, %cst_26 {dimension_numbers = #tpu.dot_dimension_numbers<[1], [0], [0], [1], [0, 0, 1, 1], [], []>} : vector<8x32xbf16>, vector<32x128xbf16>, vector<8x128xf32> -> vector<8x128xf32>
    %73 = arith.addf %52, %72 : vector<8x128xf32>
    %74 = vector.extract_strided_slice %4 {offsets = [0, 96], sizes = [8, 32], strides = [1, 1]} : vector<8x128xf32> to vector<8x32xf32>
    %75 = vector.extract_strided_slice %5 {offsets = [0, 96], sizes = [8, 32], strides = [1, 1]} : vector<8x128xf32> to vector<8x32xf32>
    %76 = vector.extract_strided_slice %6 {offsets = [0, 96], sizes = [8, 32], strides = [1, 1]} : vector<8x128xf32> to vector<8x32xf32>
    %cst_27 = arith.constant dense<0.000000e+00> : vector<8x8xf32>
    %77 = tpu.matmul %74, %75, %cst_27 {dimension_numbers = #tpu.dot_dimension_numbers<[1], [1], [0], [0], [0, 0, 1, 0], [], []>} : vector<8x32xf32>, vector<8x32xf32>, vector<8x8xf32> -> vector<8x8xf32>
    %cst_28 = arith.constant -3.40282347E+38 : f32
    %78 = vector.broadcast %cst_28 : f32 to vector<8x8xf32>
    %79 = arith.select %9, %78, %77 : vector<8x8xi1>, vector<8x8xf32>
    %cst_29 = arith.constant dense<0xFF800000> : vector<8xf32>
    %80 = vector.multi_reduction <maximumf>, %79, %cst_29 [1] : vector<8x8xf32> to vector<8xf32>
    %81 = vector.shape_cast %80 : vector<8xf32> to vector<8x1xf32>
    %82 = vector.broadcast %81 : vector<8x1xf32> to vector<8x8xf32>
    %83 = arith.subf %79, %82 : vector<8x8xf32>
    %84 = math.exp %83 : vector<8x8xf32>
    %cst_30 = arith.constant dense<0.000000e+00> : vector<8xf32>
    %85 = vector.multi_reduction <add>, %84, %cst_30 [1] : vector<8x8xf32> to vector<8xf32>
    %86 = vector.shape_cast %85 : vector<8xf32> to vector<8x1xf32>
    %87 = tpu.reciprocal %86 {approx = true} : vector<8x1xf32> -> vector<8x1xf32>
    %88 = vector.broadcast %87 : vector<8x1xf32> to vector<8x8xf32>
    %89 = arith.mulf %84, %88 : vector<8x8xf32>
    %cst_31 = arith.constant dense<0.000000e+00> : vector<8x32xf32>
    %90 = tpu.matmul %89, %76, %cst_31 {dimension_numbers = #tpu.dot_dimension_numbers<[1], [0], [0], [1], [0, 0, 1, 1], [], []>} : vector<8x8xf32>, vector<8x32xf32>, vector<8x32xf32> -> vector<8x32xf32>
    %91 = arith.truncf %90 : vector<8x32xf32> to vector<8x32xbf16>
    %c96 = arith.constant 96 : index
    %c0_32 = arith.constant 0 : index
    %92 = vector.load %arg3[%c96, %c0_32] : memref<128x128xbf16, #tpu.memory_space<vmem>>, vector<32x128xbf16>
    %cst_33 = arith.constant dense<0.000000e+00> : vector<8x128xf32>
    %93 = tpu.matmul %91, %92, %cst_33 {dimension_numbers = #tpu.dot_dimension_numbers<[1], [0], [0], [1], [0, 0, 1, 1], [], []>} : vector<8x32xbf16>, vector<32x128xbf16>, vector<8x128xf32> -> vector<8x128xf32>
    %94 = arith.addf %73, %93 : vector<8x128xf32>
    %c0_34 = arith.constant 0 : index
    %c0_35 = arith.constant 0 : index
    %c0_36 = arith.constant 0 : index
    %95 = vector.load %arg4[%c0_34, %c0_35, %c0_36] : memref<1x8x128xf32, #tpu.memory_space<vmem>>, vector<1x8x128xf32>
    %96 = vector.shape_cast %95 : vector<1x8x128xf32> to vector<8x128xf32>
    %97 = vector.shape_cast %94 : vector<8x128xf32> to vector<1x8x128xf32>
    tpu.vector_store %arg4[%c0_34, %c0_35, %c0_36], %97 {strides = array<i32>} : memref<1x8x128xf32, #tpu.memory_space<vmem>>, vector<1x8x128xf32>,
    return
  }
  func.func @transform_0(%arg0: i32) -> (i32, i32, i32) {
    %c0_i32 = arith.constant 0 : i32
    %c0_i32_0 = arith.constant 0 : i32
    %c0_i32_1 = arith.constant 0 : i32
    return %arg0, %c0_i32, %c0_i32_0 : i32, i32, i32
  }
  func.func @transform_1(%arg0: i32) -> (i32, i32) {
    %c0_i32 = arith.constant 0 : i32
    %c0_i32_0 = arith.constant 0 : i32
    %c0_i32_1 = arith.constant 0 : i32
    return %c0_i32, %c0_i32_0 : i32, i32
  }
  func.func @transform_2(%arg0: i32) -> (i32, i32) {
    %c0_i32 = arith.constant 0 : i32
    %c0_i32_0 = arith.constant 0 : i32
    %c0_i32_1 = arith.constant 0 : i32
    return %c0_i32, %c0_i32_0 : i32, i32
  }
  func.func @transform_3(%arg0: i32) -> (i32, i32, i32) {
    %c0_i32 = arith.constant 0 : i32
    %c0_i32_0 = arith.constant 0 : i32
    %c0_i32_1 = arith.constant 0 : i32
    return %arg0, %c0_i32, %c0_i32_0 : i32, i32, i32
  }
}

</mosaic_0001>

<bundles_post_ra>
// kernel: base_mha.1
= control target key start
LH: loop header
LB: loop body
LE: loop exit
PB: predicated region body
PF: predicated region fallthrough
CT: control target
= control target key end

     0   :  { %8 = vsyncpa [#allocation3], 0  ;;  %s1487_s0 = inlined_call_operand.vmem [shape: bf16[2,8,128], index: 0, kind: input, shape index: {}]   ;;  %s1488_s1 = inlined_call_operand.hbm [shape: bf16[128,384], index: 1, kind: input, shape index: {}]   ;;  %s1489_s2 = inlined_call_operand.hbm [shape: bf16[128,128], index: 2, kind: input, shape index: {}]   ;;  %s1490_s3 = inlined_call_operand.hbm [shape: f32[2,8,128], index: 3, kind: output, shape index: {}]  }
   0x1   :  { %9 = vsyncpa [#allocation6], 0 }
   0x2   :  { %10 = vsyncpa [#allocation4], 0 }
   0x3   :  { %12 = vsyncpa [#allocation4 + $0x1], 0  ;;  %s1334_s12 = smov 0   ;;  %s1336_s13 = smov 0  }
   0x4   :  { %s1338_s14 = smov 0   ;;  %s1340_s15 = smov 0  }
   0x5 LB: > { %s1355_s16 = sadd.s32 4294967295, %s1303_s15   ;;  %s900_s17 = sadd.s32 4294967294, %s1303_s15   ;;  %s1303_s15 = sphi %s1340_s15, %s1497_s15   ;;  %s1299_s14 = sphi %s1338_s14, %s1496_s14   ;;  %s1295_s13 = sphi %s1336_s13, %s1495_s13   ;;  %s1291_s12 = sphi %s1334_s12, %s1494_s12  }
   0x6   : > { %s1359_s18 = sadd.s32 1, %s1303_s15   ;;  %s93_s19 = sadd.s32 1, %s1299_s14 }
   0x7   : > { %s90_s20 = ssub.s32 %s1303_s15, %s1359_s18  ;;  %p103_p0 = scmp.ne.s32.totalorder %s1299_s14, %s1295_s13 }
   0x8   : > { %p91_p1 = scmp.eq.s32.totalorder %s90_s20, 0  ;;  %p104_p2 = scmp.eq.s32.totalorder %s1355_s16, 1 }
   0x9   : > { %p109_p3 = scmp.ne.s32.totalorder %s1295_s13, %s1291_s12  ;;  %p110_p4 = scmp.eq.s32.totalorder %s900_s17, 1 }
   0xa   : > { %s1370_s21 = scalar_select %p91_p1, %s1299_s14, %s93_s19  }
   0xb   : > { %p1372_p5 = por %p104_p2, %p103_p0  ;;  %p1376_p6 = por %p110_p4, %p109_p3 }
   0xc   : > { %p901_p7 = scmp.ge.s32.totalorder %s1303_s15, 1  ;;  %p117_p8 = scmp.lt.s32.totalorder %s1303_s15, 3 }
   0xd   : > { %p1111_p9 = scmp.eq.s32.totalorder %s1355_s16, 0  ;;  %s128_s27 = sshll.u32 %s1488_s1, 4  ;;  %s129_s27 = int_to_ptr.hbm [resolvable:$true] %s128_s27 }
   0xe   : > { %p1383_p10 = pnand %p901_p7, %p117_p8  ;;  %s1305_s28 = smov [#allocation2]  }
   0xf   : > { %s130_s29 = sshll.u32 %s1305_s28, 4  ;;  %s142_s5 = sshll.u32 %s1489_s2, 4  ;;  %s131_s29 = int_to_ptr.vmem [resolvable:$true] %s130_s29  ;;  %s143_s5 = int_to_ptr.hbm [resolvable:$true] %s142_s5 }
  0x10   : > { %p1100_p11 = pneg %p1383_p10  ;;  %s1306_s6 = smov 192  }
  0x11   : > { %s1307_s7 = smov 12   ;;  %s1308_s8 = smov [#allocation5]  }
  0x12   : > { %p1101_p12 = pnand %p1111_p9, %p1100_p11  ;;  %s144_s9 = sshll.u32 %s1308_s8, 4  ;;  %s145_s9 = int_to_ptr.vmem [resolvable:$true] %s144_s9 }
  0x13   : > { %s1309_s10 = smov 64   ;;  %s1310_s11 = smov 4  }
  0x14   : > { %1103 = dma.hbm_to_vmem [thread:$0]  (!%p1101_p12), %s129_s27, 3072, %s131_s29, [#allocation3], %s1306_s6, %s1306_s6, %s1307_s7  }
  0x15   : > { %1106 = dma.hbm_to_vmem [thread:$0]  (!%p1101_p12), %s143_s5, 1024, %s145_s9, [#allocation6], %s1309_s10, %s1309_s10, %s1310_s11  }
  0x16   : > { %167 = sbr.rel (%p1383_p10) target bundleno = 1267 (0x4f3), region = 32 }
  0x1b   : > { %1278 = dma.done.wait (%p1111_p9), [#allocation3], 3072  }
  0x1c   : > { %1280 = vsyncadd (%p1111_p9), [#allocation3], 4294964224 }
  0x1d   : > { %1282 = dma.done.wait (%p1111_p9), [#allocation6], 1024  }
  0x1e   : > { %1284 = vsyncadd (%p1111_p9), [#allocation6], 4294966272  ;;  %v996_v0 = vld [vmem:[#allocation2 + $0xa8] sm:$0xf]  ;;  %v1080_v1 = vld [vmem:[#allocation2 + $0xb0] sm:$0xf0] }
  0x1f   : > { %v1079_v2 = vld [vmem:[#allocation2 + $0xac] sm:$0xf]  ;;  %v997_v3 = vor.u32 %v1080_v1, %v996_v0  ;;  %v998_v4 = vld [vmem:[#allocation2 + $0xb4] sm:$0xf0]  ;;  %v984_v5 = vld [vmem:[#allocation2 + $0x90] sm:$0xf] }
  0x20   : > { %v1077_v6 = vld [vmem:[#allocation2 + $0x98] sm:$0xf0]  ;;  %v1001_v7 = vor.u32 %v1079_v2, %v998_v4  ;;  %v1076_v8 = vld [vmem:[#allocation2 + $0x94] sm:$0xf]  ;;  %v986_v9 = vld [vmem:[#allocation2 + $0x9c] sm:$0xf0] }
  0x21   : > { %362 = vmatpush.bf16.msra.mxu0 %v997_v3  ;;  %v985_v10 = vor.u32 %v1077_v6, %v984_v5  ;;  %v989_v11 = vor.u32 %v1076_v8, %v986_v9  ;;  %v972_v12 = vld [vmem:[#allocation2 + $0x78] sm:$0xf]  ;;  %v1074_v13 = vld [vmem:[#allocation2 + $0x80] sm:$0xf0]  ;;  %v1073_v14 = vld [vmem:[#allocation2 + $0x7c] sm:$0xf] }
  0x22   : > { %375 = vmatpush.bf16.msra.mxu1 %v1001_v7  ;;  %v974_v15 = vld [vmem:[#allocation2 + $0x84] sm:$0xf0]  ;;  %v973_v16 = vor.u32 %v1074_v13, %v972_v12  ;;  %v960_v18 = vld [vmem:[#allocation2 + $0x60] sm:$0xf]  ;;  %v1071_v19 = vld [vmem:[#allocation2 + $0x68] sm:$0xf0] }
  0x23   : > { %v977_v17 = vor.u32 %v1073_v14, %v974_v15  ;;  %v1070_v20 = vld [vmem:[#allocation2 + $0x64] sm:$0xf]  ;;  %v962_v21 = vld [vmem:[#allocation2 + $0x6c] sm:$0xf0]  ;;  %v961_v22 = vor.u32 %v1071_v19, %v960_v18  ;;  %v1081_v24 = vld [vmem:[#allocation2 + $0xb8] sm:$0xf0]  ;;  %v401_v18 = vlaneseq }
  0x24   : > { %v1004_v23 = vld [vmem:[#allocation2 + $0xb0] sm:$0xf]  ;;  %v992_v25 = vld [vmem:[#allocation2 + $0x98] sm:$0xf]  ;;  %v965_v26 = vor.u32 %v1070_v20, %v962_v21  ;;  %v948_v27 = vld [vmem:[#allocation2 + $0x48] sm:$0xf] }
  0x25   : > { %363 = vmatpush.bf16.msra.mxu0 %v985_v10  ;;  %v1068_v28 = vld [vmem:[#allocation2 + $0x50] sm:$0xf0]  ;;  %v1005_v29 = vor.u32 %v1081_v24, %v1004_v23  ;;  %v1078_v30 = vld [vmem:[#allocation2 + $0xa0] sm:$0xf0]  ;;  %v1067_v31 = vld [vmem:[#allocation2 + $0x4c] sm:$0xf] }
  0x26   : > { %376 = vmatpush.bf16.msra.mxu1 %v989_v11  ;;  %v950_v32 = vld [vmem:[#allocation2 + $0x54] sm:$0xf0]  ;;  %v993_v33 = vor.u32 %v1078_v30, %v992_v25  ;;  %v949_v34 = vor.u32 %v1068_v28, %v948_v27  ;;  %v980_v35 = vld [vmem:[#allocation2 + $0x80] sm:$0xf]  ;;  %v1075_v36 = vld [vmem:[#allocation2 + $0x88] sm:$0xf0] }
  0x27   : > { %388 = vmatpush.bf16.msra.mxu2 %v1005_v29  ;;  %v953_v37 = vor.u32 %v1067_v31, %v950_v32  ;;  %v936_v38 = vld [vmem:[#allocation2 + $0x30] sm:$0xf]  ;;  %v1065_v39 = vld [vmem:[#allocation2 + $0x38] sm:$0xf0]  ;;  %v1064_v40 = vld [vmem:[#allocation2 + $0x34] sm:$0xf]  ;;  %v981_v42 = vor.u32 %v1075_v36, %v980_v35 }
  0x28   : > { %v938_v41 = vld [vmem:[#allocation2 + $0x3c] sm:$0xf0]  ;;  %p196_p13 = scmp.lt.s32.totalorder %s1355_s16, 1  ;;  %v937_v43 = vor.u32 %v1065_v39, %v936_v38  ;;  %v968_v44 = vld [vmem:[#allocation2 + $0x68] sm:$0xf]  ;;  %vm406_vm0 = vcmask 261120  }
  0x29   : > { %364 = vmatpush.bf16.msra.mxu0 %v973_v16  ;;  %v1072_v45 = vld [vmem:[#allocation2 + $0x70] sm:$0xf0]  ;;  %v941_v46 = vor.u32 %v1064_v40, %v938_v41  ;;  %v924_v47 = vld [vmem:[#allocation2 + $0x18] sm:$0xf]  ;;  %v1062_v48 = vld [vmem:[#allocation2 + $0x20] sm:$0xf0] }
  0x2a   : > { %377 = vmatpush.bf16.msra.mxu1 %v977_v17  ;;  %v1061_v49 = vld [vmem:[#allocation2 + $0x1c] sm:$0xf]  ;;  %v926_v50 = vld [vmem:[#allocation2 + $0x24] sm:$0xf0]  ;;  %s197_s17 = scalar_select %p196_p13, %s1355_s16, 1  ;;  %v969_v51 = vor.u32 %v1072_v45, %v968_v44  ;;  %v925_v52 = vor.u32 %v1062_v48, %v924_v47  ;;  %v402_v19 = vshrl.u32 %v401_v18, 7 }
  0x2b   : > { %389 = vmatpush.bf16.msra.mxu2 %v993_v33  ;;  %v956_v53 = vld [vmem:[#allocation2 + $0x50] sm:$0xf]  ;;  %v1069_v54 = vld [vmem:[#allocation2 + $0x58] sm:$0xf0]  ;;  %v929_v55 = vor.u32 %v1061_v49, %v926_v50  ;;  %v912_v56 = vld [vmem:[#allocation2] sm:$0xf] }
  0x2c   : > { %v1059_v57 = vld [vmem:[#allocation2 + $0x8] sm:$0xf0]  ;;  %v1058_v58 = vld [vmem:[#allocation2 + $0x4] sm:$0xf]  ;;  %v914_v59 = vld [vmem:[#allocation2 + $0xc] sm:$0xf0]  ;;  %v957_v60 = vor.u32 %v1069_v54, %v956_v53 }
  0x2d   : > { %365 = vmatpush.bf16.msra.mxu0 %v961_v22  ;;  %s909_s19 = sshll.u32 %s197_s17, 2  ;;  %v913_v61 = vor.u32 %v1059_v57, %v912_v56  ;;  %v944_v62 = vld [vmem:[#allocation2 + $0x38] sm:$0xf]  ;;  %v1066_v63 = vld [vmem:[#allocation2 + $0x40] sm:$0xf0]  ;;  %v917_v0 = vor.u32 %v1058_v58, %v914_v59  ;;  %s1311_s26 = smov 64  }
  0x2e   : > { %378 = vmatpush.bf16.msra.mxu1 %v965_v26  ;;  %s199_s25 = scalar_lea.vmem %s1487_s0, %s909_s19  ;;  %v945_v1 = vor.u32 %v1066_v63, %v944_v62  ;;  %v932_v3 = vld [vmem:[#allocation2 + $0x20] sm:$0xf]  ;;  %v1063_v4 = vld [vmem:[#allocation2 + $0x28] sm:$0xf0]  ;;  %v920_v6 = vld [vmem:[#allocation2 + $0x8] sm:$0xf] }
  0x2f   : > { %390 = vmatpush.bf16.msra.mxu2 %v981_v42  ;;  %v201_v2 = vld [vmem:[%s199_s25] sm:$0xf]  ;;  %v933_v5 = vor.u32 %v1063_v4, %v932_v3  ;;  %v1060_v7 = vld [vmem:[#allocation2 + $0x10] sm:$0xf0]  ;;  %s1312_s27 = smov 96   ;;  %s1313_s28 = smov 32  }
  0x30   : > { %v921_v8 = vor.u32 %v1060_v7, %v920_v6  ;;  %v404_v20 = vand.u32 127, %v401_v18  ;;  %vm434_vm2 = vcmask 64512   ;;  %v1082_v44 = vld [vmem:[#allocation5] sm:$0xff]  ;;  %v1085_v7 = vld [vmem:[#allocation5 + $0x18] sm:$0xff]  ;;  %s193_s29 = sand.u32 1, %s1295_s13   ;;  %s1055_s4 = sshll.u32 %s1355_s16, 3 }
  0x31   : > { %366 = vmatpush.bf16.msra.mxu0 %v949_v34  ;;  %v1086_v18 = vld [vmem:[#allocation5 + $0x20] sm:$0xff]  ;;  %s908_s30 = sshll.u32 %s193_s29, 3  ;;  %s814_s7 = scalar_lea.hbm %s1490_s3, %s1055_s4 }
  0x32   : > { %379 = vmatpush.bf16.msra.mxu1 %v953_v37  ;;  %vm405_vm1 = vcmp.gt.s32.totalorder %v404_v20, %v402_v19  ;;  %s195_s8 = scalar_lea.vmem [#allocation7], %s908_s30  ;;  %s818_s10 = sshll.u32 %s814_s7, 4  ;;  %s819_s10 = int_to_ptr.hbm [resolvable:$true] %s818_s10 }
  0x33   : > { %391 = vmatpush.bf16.msra.mxu2 %v969_v51  ;;  %s816_s9 = sshll.u32 %s195_s8, 4  ;;  %s804_s11 = scalar_lea.sflag [#allocation4], %s193_s29  ;;  %s817_s9 = int_to_ptr.vmem [resolvable:$true] %s816_s9 }
  0x34   : > { %s1247_s17 = sshra.s32 %s819_s10, 4  ;;  %s1253_s24 = scalar_lea.hbm %s1490_s3, 16  ;;  %s1248_s17 = int_to_ptr.hbm [resolvable:$true] %s1247_s17 }
  0x35   : > { %367 = vmatpush.bf16.msra.mxu0 %v937_v43  ;;  %v1083_v43 = vld [vmem:[#allocation5 + $0x8] sm:$0xff]  ;;  %s1249_s16 = scalar_lea.hbm %s1248_s17, 8  ;;  %p1254_p3 = scmp.lt.s32.totalorder %s1248_s17, %s1490_s3 }
  0x36   : > { %380 = vmatpush.bf16.msra.mxu1 %v941_v46  ;;  %p1250_p0 = scmp.ne.s32.totalorder %s1248_s17, %s1249_s16  ;;  %p1255_p4 = scmp.lt.s32.totalorder %s1253_s24, %s1249_s16 }
  0x37   : > { %392 = vmatpush.bf16.msra.mxu2 %v957_v60 }
  0x38   : > { %p1251_p1 = pnand %p1250_p0, %p1372_p5  ;;  %p1256_p7 = por %p1255_p4, %p1254_p3 }
  0x39   : > { %368 = vmatpush.bf16.msra.mxu0 %v925_v52 }
  0x3a   : > { %381 = vmatpush.bf16.msra.mxu1 %v929_v55  ;;  %p1252_p2 = pneg %p1251_p1 }
  0x3b   : > { %393 = vmatpush.bf16.msra.mxu2 %v945_v1 }
  0x3c   : > { %p1257_p8 = pnand %p1256_p7, %p1252_p2 }
  0x3d   : > { %369 = vmatpush.bf16.msra.mxu0 %v913_v61 }
  0x3e   : > { %382 = vmatpush.bf16.msra.mxu1 %v917_v0 }
  0x3f   : > { %394 = vmatpush.bf16.msra.mxu2 %v933_v5 }
  0x40   : > { %370 = vmatmul.bf16.vlgmr.msra.gmra.mxu0 %v201_v2 }
  0x41   : > { %383 = vmatmul.bf16.vlgmr.msra.gmra.mxu1 %v201_v2  ;;  %595 = vmatpush.bf16.msrb.mxu0 %v1083_v43 }
  0x43   : > { %395 = vmatpush.bf16.msra.mxu2 %v921_v8 }
  0x45   : > { %596 = vmatpush.bf16.msrb.mxu0 %v1082_v44 }
  0x46   : > { %396 = vmatmul.bf16.vlgmr.msra.gmra.mxu2 %v201_v2 }
  0xbd   : > { %v371_v9 = vpop.f32.mrf.mxu0 }
  0xbe   : > { %v384_v10 = vpop.f32.mrf.mxu1 }
  0xbf   : > { %604 = vrot.lane.b32.xlu2 %v384_v10, %s1311_s26  ;;  %476 = vrot.lane.b32.xlu1 %v384_v10, %s1312_s27 }
  0xc0   : > { %1006 = vmatpush.xpose.msk.msra.mxu3 %vm406_vm0, %v384_v10 }
  0xc3   : > { %1007 = vmatmul.msk.f32.vlgmr.msra.gmra.mxu3 %vm406_vm0, %v371_v9 }
  0xc5   : > { %v373_v11 = vpop.f32.mrf.mxu0 }
  0xc6   : > { %v386_v12 = vpop.f32.mrf.mxu1 }
  0xc7   : > { %602 = vrot.lane.b32.xlu2 %v371_v9, %s1311_s26  ;;  %474 = vrot.lane.b32.xlu1 %v371_v9, %s1312_s27 }
  0xc9   : > { %v1419_v13 = vpop.f32.mrf.mxu2 }
  0xca   : > { %464 = vmatpush.msrb.mxu3 %v1419_v13 }
  0xcf   : > { %702 = vrot.lane.b32.xlu1 %v371_v9, %s1313_s28 }
  0xd1   : > { %v399_v14 = vpop.f32.mrf.mxu2 }
 0x119   : > { %v605_v15 = vpop.permute.xlu2 %604 }
 0x11a   : > { %1030 = vmatpush.xpose.msk.msrb.mxu1 %vm406_vm0, %v605_v15  ;;  %v1084_v15 = vld [vmem:[#allocation5 + $0x10] sm:$0xff] }
 0x121   : > { %v603_v16 = vpop.permute.xlu2 %602 }
 0x122   : > { %1031 = vmatmul.msk.f32.vlgmr.msrb.gmra.mxu1 %vm406_vm0, %v603_v16  ;;  %v1089_v16 = vld [vmem:[#allocation5 + $0x38] sm:$0xff] }
 0x123   : > { %794 = vmatpush.bf16.msra.mxu0 %v1089_v16 }
 0x131   : > { %v477_v17 = vpop.permute.xlu1 %476 }
 0x132   : > { %1009 = vmatpush.xpose.msk.msra.mxu3 %vm406_vm0, %v477_v17  ;;  %v1088_v17 = vld [vmem:[#allocation5 + $0x30] sm:$0xff] }
 0x133   : > { %795 = vmatpush.bf16.msra.mxu0 %v1088_v17 }
 0x139   : > { %v475_v32 = vpop.permute.xlu1 %474 }
 0x141   : > { %v703_v33 = vpop.permute.xlu1 %702 }
 0x146   : > { %v430_v21 = vpop.f32.mrf.mxu3 }
 0x147   : > { %v433_v22 = vsel %vm405_vm1, -3.4028235e+38, %v430_v21 }
 0x148   : > { %v435_v23 = vsel %vm434_vm2, %v433_v22, -inf }
 0x149   : > { %436 = vmax.xlane.f32.xlu0 %v435_v23 }
 0x19f   : > { %v627_v24 = vpop.f32.mrf.mxu1 }
 0x1a0   : > { %v630_v25 = vsel %vm405_vm1, -3.4028235e+38, %v627_v24 }
 0x1a1   : > { %v631_v26 = vsel %vm434_vm2, %v630_v25, -inf }
 0x1a2   : > { %632 = vmax.xlane.f32.xlu1 %v631_v26 }
 0x1bc   : > { %v437_v27 = vpop.xlane.xlu0 %436 }
 0x1bd   : > { %v438_v28 = vsub.f32 %v433_v22, %v437_v27 }
 0x1bf   : > { %v439_v29 = vmul.f32 1.442695, %v438_v28 }
 0x1c1   : > { %1157 = vpow2.f32 %v439_v29 }
 0x1c7   : > { %v1158_v30 = vpop.eup %1157 }
 0x1c8   : > { %v441_v31 = vsel %vm434_vm2, %v1158_v30, 0.0 }
 0x1c9   : > { %442 = vadd.xlane.f32.xlu0 %v441_v31 }
 0x1dd   : > { %704 = vrot.lane.b32.xlu0 %v384_v10, %s1313_s28 }
 0x215   : > { %v633_v34 = vpop.xlane.xlu1 %632 }
 0x216   : > { %v634_v35 = vsub.f32 %v630_v25, %v633_v34 }
 0x218   : > { %v635_v36 = vmul.f32 1.442695, %v634_v35 }
 0x21a   : > { %1159 = vpow2.f32 %v635_v36 }
 0x220   : > { %v1160_v37 = vpop.eup %1159 }
 0x221   : > { %v637_v38 = vsel %vm434_vm2, %v1160_v37, 0.0 }
 0x222   : > { %638 = vadd.xlane.f32.xlu1 %v637_v38 }
 0x23c   : > { %v443_v39 = vpop.xlane.xlu0 %442 }
 0x23d   : > { %1161 = vrcp.f32 %v443_v39 }
 0x243   : > { %v1162_v40 = vpop.eup %1161 }
 0x244   : > { %v445_v41 = vmul.f32 %v1162_v40, %v1158_v30 }
 0x246   : > { %1008 = vmatmul.msk.f32.vlgmr.msrb.gmra.mxu3 %vm434_vm2, %v445_v41 }
 0x24e   : > { %1010 = vmatmul.msk.f32.vlgmr.msra.gmra.mxu3 %vm406_vm0, %v475_v32 }
 0x24f   : > { %v705_v42 = vpop.permute.xlu0 %704 }
 0x250   : > { %1042 = vmatpush.xpose.msk.msra.mxu1 %vm406_vm0, %v705_v42 }
 0x253   : > { %1043 = vmatmul.msk.f32.vlgmr.msra.gmra.mxu1 %vm406_vm0, %v703_v33 }
 0x295   : > { %v639_v60 = vpop.xlane.xlu1 %638 }
 0x2c9   : > { %v466_v45 = vpop.f32.mrf.mxu3 }
 0x2ca   : > { %v469_v46 = vpack.c.bf16 %v466_v45, %v466_v45 }
 0x2cc   : > { %1029 = vmatmul.msk.bf16.vlgmr.msrb.gmra.mxu0 %vm406_vm0, %v469_v46 }
 0x2d0   : > { %v727_v47 = vpop.f32.mrf.mxu1 }
 0x2d1   : > { %v730_v48 = vsel %vm405_vm1, -3.4028235e+38, %v727_v47  ;;  %v499_v49 = vpop.f32.mrf.mxu3 }
 0x2d2   : > { %v502_v50 = vsel %vm405_vm1, -3.4028235e+38, %v499_v49  ;;  %v731_v51 = vsel %vm434_vm2, %v730_v48, -inf }
 0x2d3   : > { %732 = vmax.xlane.f32.xlu0 %v731_v51  ;;  %v503_v52 = vsel %vm434_vm2, %v502_v50, -inf }
 0x2d4   : > { %504 = vmax.xlane.f32.xlu2 %v503_v52 }
 0x2e7   : > { %642 = vrot.lane.b32.xlu0 %v1419_v13, %s1311_s26 }
 0x346   : > { %v733_v53 = vpop.xlane.xlu0 %732 }
 0x347   : > { %v734_v54 = vsub.f32 %v730_v48, %v733_v53  ;;  %v505_v55 = vpop.xlane.xlu2 %504 }
 0x348   : > { %v506_v56 = vsub.f32 %v502_v50, %v505_v55 }
 0x349   : > { %v735_v57 = vmul.f32 1.442695, %v734_v54  ;;  %v598_v58 = vpop.f32.mrf.mxu0 }
 0x34a   : > { %v507_v59 = vmul.f32 1.442695, %v506_v56 }
 0x34b   : > { %1163 = vpow2.f32 %v735_v57 }
 0x34c   : > { %1165 = vpow2.f32 %v507_v59 }
 0x34d   : > { %1167 = vrcp.f32 %v639_v60 }
 0x351   : > { %v1164_v61 = vpop.eup %1163  ;;  %v600_v62 = vpop.f32.mrf.mxu0 }
 0x352   : > { %v1166_v63 = vpop.eup %1165  ;;  %v737_v0 = vsel %vm434_vm2, %v1164_v61, 0.0 }
 0x353   : > { %738 = vadd.xlane.f32.xlu1 %v737_v0  ;;  %v509_v1 = vsel %vm434_vm2, %v1166_v63, 0.0  ;;  %v1168_v2 = vpop.eup %1167 }
 0x354   : > { %510 = vadd.xlane.f32.xlu2 %v509_v1  ;;  %v641_v4 = vmul.f32 %v1168_v2, %v1160_v37 }
 0x359   : > { %v643_v3 = vpop.permute.xlu0 %642 }
 0x35a   : > { %663 = vmatpush.msrb.mxu2 %v643_v3 }
 0x35b   : > { %1032 = vmatmul.msk.f32.vlgmr.msrb.gmra.mxu2 %vm434_vm2, %v641_v4 }
 0x36c   : > { %515 = vrot.lane.b32.xlu2 %v1419_v13, %s1312_s27  ;;  %742 = vrot.lane.b32.xlu1 %v1419_v13, %s1313_s28  ;;  %v1087_v13 = vld [vmem:[#allocation5 + $0x28] sm:$0xff] }
 0x3c6   : > { %v739_v10 = vpop.xlane.xlu1 %738 }
 0x3c7   : > { %v511_v5 = vpop.xlane.xlu2 %510 }
 0x3c8   : > { %1169 = vrcp.f32 %v511_v5 }
 0x3c9   : > { %1171 = vrcp.f32 %v739_v10 }
 0x3ce   : > { %v1170_v6 = vpop.eup %1169 }
 0x3cf   : > { %v513_v8 = vmul.f32 %v1170_v6, %v1166_v63  ;;  %v516_v9 = vpop.permute.xlu2 %515  ;;  %v1172_v11 = vpop.eup %1171 }
 0x3d0   : > { %536 = vmatpush.msrb.mxu3 %v516_v9  ;;  %v741_v12 = vmul.f32 %v1172_v11, %v1164_v61 }
 0x3d1   : > { %1011 = vmatmul.msk.f32.vlgmr.msrb.gmra.mxu3 %vm434_vm2, %v513_v8 }
 0x3d2   : > { %567 = vmatpush.bf16.msra.mxu3 %v1085_v7 }
 0x3d6   : > { %568 = vmatpush.bf16.msra.mxu3 %v1084_v15 }
 0x3da   : > { %694 = vmatpush.bf16.msrb.mxu3 %v1087_v13 }
 0x3de   : > { %v743_v14 = vpop.permute.xlu1 %742  ;;  %695 = vmatpush.bf16.msrb.mxu3 %v1086_v18  ;;  %v665_v21 = vpop.f32.mrf.mxu2 }
 0x3df   : > { %763 = vmatpush.msra.mxu2 %v743_v14  ;;  %v668_v24 = vpack.c.bf16 %v665_v21, %v665_v21 }
 0x3e0   : > { %1044 = vmatmul.msk.f32.vlgmr.msra.gmra.mxu2 %vm434_vm2, %v741_v12 }
 0x454   : > { %v538_v19 = vpop.f32.mrf.mxu3 }
 0x455   : > { %v541_v20 = vpack.c.bf16 %v538_v19, %v538_v19 }
 0x457   : > { %1020 = vmatmul.msk.bf16.vlgmr.msra.gmra.mxu3 %vm406_vm0, %v541_v20 }
 0x463   : > { %v765_v22 = vpop.f32.mrf.mxu2 }
 0x464   : > { %v768_v23 = vpack.c.bf16 %v765_v22, %v765_v22 }
 0x466   : > { %1053 = vmatmul.msk.bf16.vlgmr.msra.gmra.mxu0 %vm406_vm0, %v768_v23 }
 0x467   : > { %1041 = vmatmul.msk.bf16.vlgmr.msrb.gmra.mxu3 %vm406_vm0, %v668_v24 }
 0x4da   : > { %v570_v25 = vpop.f32.mrf.mxu3 }
 0x4db   : > { %v599_v28 = vadd.f32 %v598_v58, %v570_v25 }
 0x4e2   : > { %v572_v26 = vpop.f32.mrf.mxu3 }
 0x4e3   : > { %v797_v27 = vpop.f32.mrf.mxu0 }
 0x4ea   : > { %v697_v29 = vpop.f32.mrf.mxu3 }
 0x4eb   : > { %v701_v30 = vadd.f32 %v697_v29, %v599_v28  ;;  %v799_v31 = vpop.f32.mrf.mxu0 }
 0x4ed   : > { %v801_v32 = vadd.f32 %v797_v27, %v701_v30 }
 0x4ef   : > { %802 = vst [vmem:[%s195_s8] sm:$0xff] %v801_v32 }
 0x4f0   : > { %1260 = shalt.err (!%p1257_p8)
}
 0x4f1   : > { %1098 = dma.vmem_to_hbm [thread:$0]  (%p1372_p5), %s817_s9, 128, %s819_s10, %s804_s11  }
 0x4f2   : > { %v699_v33 = vpop.f32.mrf.mxu3 }
 0x4f3 PF: > { %p1115_p9 = scmp.ge.s32.totalorder %s1303_s15, 2  ;;  %s830_s27 = sand.u32 1, %s1291_s12  }
 0x4f4   : > { %s831_s28 = scalar_lea.sflag [#allocation4], %s830_s27 }
 0x4f5   : > { %p1108_p10 = pnand %p1115_p9, %p1376_p6 }
 0x4f7   : > { %p1109_p11 = pneg %p1108_p10 }
 0x4f9   : > { %1286 = dma.done.wait (%p1109_p11), %s831_s28, 128  }
 0x4fa   : > { %1288 = vsyncadd (%p1109_p11), %s831_s28, 4294967168  ;;  %p15_p12 = scmp.ge.s32.totalorder %s1359_s18, 4   ;;  %s1494_s12 = smov %s1295_s13 }
 0x4fb   : > { %s1495_s13 = smov %s1299_s14  ;;  %s1496_s14 = smov %s1370_s21 }
 0x4fc   : > { %s1497_s15 = smov %s1359_s18  ;;  %17 = sbr.rel (!%p15_p12) target bundleno = 5 (0x5), region = 76 }
 0x501   :  { %837 = vsyncpa [#allocation3], 1 }
 0x502   :  { %839 = vsyncpa [#allocation3 + $0x1], 1 }
 0x503   :  { %840 = vsyncpa [#allocation6], 1 }
 0x504   :  { %841 = vsyncpa [#allocation4], 1 }
 0x505   :  { %843 = vsyncpa [#allocation4 + $0x1], 1 }

</bundles_post_ra>
